<compile_context>
chip_gen: v7x
topology: tpu7x:2x2x1
jax: 0.10.0
libtpu: 0.0.40
codegen_flags: <defaults>
</compile_context>

<pallas_src>
import jax
import jax.numpy as jnp
from jax.experimental import pallas as pl
from jax.experimental.pallas import tpu as pltpu


def _round_up(x, m):
    return ((x + m - 1) // m) * m


def _nbytes(shape, dtype):
    n = 1
    for d in shape:
        n *= int(d)
    return n * jnp.dtype(dtype).itemsize


# -----------------------------------------------------------------------------
# Kernel: one (batch_block, time_chunk) tile per grid step; hidden carried in
# VMEM scratch across time chunks.
# -----------------------------------------------------------------------------
def _gru_chunk_kernel(gi_ref, h0_ref, whh_ref, bhh_ref, hseq_ref, h_scr):
    tc = pl.program_id(1)

    @pl.when(tc == 0)
    def _init():
        # Load the initial hidden state for this batch block once.
        h_scr[...] = h0_ref[...].astype(jnp.float32)

    t_chunk = gi_ref.shape[0]                  # static chunk length
    Hp = h_scr.shape[-1]                       # padded latent size (multiple of 128)
    whh = whh_ref[...]                         # [Hp, 3*Hp] resident (maybe bf16)
    bhh = bhh_ref[...]                         # [1, 3*Hp] f32

    h = h_scr[...]                             # [Bb, Hp] f32 carry
    for i in range(t_chunk):                   # static unroll (small chunk)
        gi = gi_ref[i].astype(jnp.float32)     # [Bb, 3*Hp] precomputed x@W_ih^T + b_ih
        gh = jnp.dot(h.astype(whh.dtype), whh,
                     preferred_element_type=jnp.float32) + bhh
        # Lane-aligned (r, z, n) gate slices — torch GRUCell ordering & math.
        r = jax.nn.sigmoid(gi[:, 0:Hp] + gh[:, 0:Hp])
        z = jax.nn.sigmoid(gi[:, Hp:2 * Hp] + gh[:, Hp:2 * Hp])
        n = jnp.tanh(gi[:, 2 * Hp:3 * Hp] + r * gh[:, 2 * Hp:3 * Hp])
        h = (1.0 - z) * n + z * h
        hseq_ref[i] = h.astype(hseq_ref.dtype)

    h_scr[...] = h                             # carry to the next time chunk (VMEM only)


# -----------------------------------------------------------------------------
# Wrappers
# -----------------------------------------------------------------------------
def gru_rnn_forward_seq(x_seq, hidden, params, weight_dtype=jnp.float32):
    """Run the GRU over a whole sequence.

    x_seq: [T, B, input_size], hidden: [B, latent_size]
    Returns (outputs [T, B, output_size], final_hidden [B, latent_size]).
    Semantically identical to calling GRU_RNN.forward once per timestep.
    """
    T, B, I_in = x_seq.shape
    I, H, O, Hp, Op = params["dims"]
    assert I_in == I and hidden.shape == (B, H)

    # --- pad batch to a sublane multiple; pick a batch block for megacore ----
    block_b = min(_round_up(B, 8), 256)
    Bp = _round_up(B, block_b)
    nb = Bp // block_b

    # --- pick a time chunk (amortize per-grid-step overhead, bound VMEM) -----
    gi_step_bytes = block_b * 3 * Hp * 4
    t_chunk = max(1, min(T, 8, (4 << 20) // gi_step_bytes))
    Tp = _round_up(T, t_chunk)
    n_tc = Tp // t_chunk

    x_pad = jnp.zeros((Tp, Bp, I), jnp.float32).at[:T, :B, :].set(
        x_seq.astype(jnp.float32))
    h_pad = jnp.zeros((Bp, Hp), jnp.float32).at[:B, :H].set(
        hidden.astype(jnp.float32))

    # --- precompute input projection over ALL timesteps (no recurrence) ------
    w_ih = params["w_ih_t"].astype(weight_dtype)               # [I, 3*Hp]
    gi_all = jnp.dot(x_pad.reshape(Tp * Bp, I).astype(weight_dtype), w_ih,
                     preferred_element_type=jnp.float32)
    gi_all = gi_all.reshape(Tp, Bp, 3 * Hp) + params["b_ih"]   # f32

    w_hh = params["w_hh_t"].astype(weight_dtype)               # [Hp, 3*Hp]
    b_hh = params["b_hh"]                                      # [1, 3*Hp] f32

    # --- VMEM budget (explicit, with headroom; capped for v7x's 64 MiB) ------
    block_bytes = (
        _nbytes((t_chunk, block_b, 3 * Hp), jnp.float32) +   # gi chunk
        _nbytes((block_b, Hp), jnp.float32) +                # h0 block
        _nbytes((Hp, 3 * Hp), weight_dtype) +                # w_hh (resident)
        _nbytes((1, 3 * Hp), jnp.float32) +                  # b_hh
        _nbytes((t_chunk, block_b, Hp), jnp.float32)         # hidden-seq chunk
    )
    scratch_bytes = _nbytes((block_b, Hp), jnp.float32)
    needed = 2 * block_bytes + scratch_bytes + (4 << 20)
    vmem_limit = int(min(max(needed, 32 << 20), 48 << 20))
    # TODO(synk): for very large latent sizes, tile the 3*Hp axis with an extra
    # grid dimension + accumulator instead of relying on fully-resident weights.

    grid_spec = pltpu.PrefetchScalarGridSpec(
        num_scalar_prefetch=0,
        grid=(nb, n_tc),
        in_specs=[
            pl.BlockSpec((t_chunk, block_b, 3 * Hp), lambda b, t: (t, b, 0)),  # gi
            pl.BlockSpec((block_b, Hp), lambda b, t: (b, 0)),                  # h0
            pl.BlockSpec((Hp, 3 * Hp), lambda b, t: (0, 0)),                   # w_hh
            pl.BlockSpec((1, 3 * Hp), lambda b, t: (0, 0)),                    # b_hh
        ],
        out_specs=pl.BlockSpec((t_chunk, block_b, Hp), lambda b, t: (t, b, 0)),
        scratch_shapes=[pltpu.VMEM((block_b, Hp), jnp.float32)],
    )

    h_seq_pad = pl.pallas_call(
        _gru_chunk_kernel,
        grid_spec=grid_spec,
        out_shape=jax.ShapeDtypeStruct((Tp, Bp, Hp), jnp.float32),
        compiler_params=pltpu.CompilerParams(
            dimension_semantics=("parallel", "arbitrary"),
            vmem_limit_bytes=vmem_limit,
        ),
    )(gi_all, h_pad, w_hh, b_hh)

    # --- readout off the serial path: one large lane-dense MXU matmul --------
    h_seq = h_seq_pad[:T]                                       # [T, Bp, Hp]
    w_out = params["w_out_t"].astype(weight_dtype)              # [Hp, Op]
    out_all = jnp.dot(h_seq.reshape(T * Bp, Hp).astype(weight_dtype), w_out,
                      preferred_element_type=jnp.float32)
    out_all = out_all.reshape(T, Bp, Op) + params["b_out"]

    return out_all[:, :B, :O], h_seq[T - 1, :B, :H]


def gru_rnn_forward(inputs, hidden, params, weight_dtype=jnp.float32):
    """Equivalent of GRU_RNN.forward(inputs, hidden) -> (output, hidden)."""
    out_seq, h_new = gru_rnn_forward_seq(inputs[None], hidden, params,
                                         weight_dtype=weight_dtype)
    return out_seq[0], h_new


# -----------------------------------------------------------------------------
# Parameters (torch-style logical weights + padded kernel layout)
# -----------------------------------------------------------------------------
def init_params(key, input_size, latent_size, output_size):
    """Logical (unpadded) params, torch GRUCell/Linear layout + default init."""
    k = jax.random.split(key, 6)
    s = 1.0 / jnp.sqrt(latent_size)
    w_ih = jax.random.uniform(k[0], (3 * latent_size, input_size), jnp.float32, -s, s)
    w_hh = jax.random.uniform(k[1], (3 * latent_size, latent_size), jnp.float32, -s, s)
    b_ih = jax.random.uniform(k[2], (3 * latent_size,), jnp.float32, -s, s)
    b_hh = jax.random.uniform(k[3], (3 * latent_size,), jnp.float32, -s, s)
    w_out = jax.random.uniform(k[4], (output_size, latent_size), jnp.float32, -s, s)
    b_out = jax.random.uniform(k[5], (output_size,), jnp.float32, -s, s)
    latent_ics = jnp.zeros((latent_size,), jnp.float32)
    return dict(w_ih=w_ih, w_hh=w_hh, b_ih=b_ih, b_hh=b_hh, w_out=w_out,
                b_out=b_out, latent_ics=latent_ics,
                sizes=(input_size, latent_size, output_size))


def pack_params(raw):
    """Pad to lane-aligned kernel layout: each gate occupies its own Hp block."""
    I, H, O = raw["sizes"]
    Hp = _round_up(H, 128)
    Op = _round_up(O, 128)

    def pack_gates_T(w):                       # [3H, K] -> [K, 3*Hp] (transposed)
        K = w.shape[1]
        out = jnp.zeros((K, 3 * Hp), jnp.float32)
        for g in range(3):
            out = out.at[:, g * Hp: g * Hp + H].set(w[g * H:(g + 1) * H, :].T)
        return out

    def pack_gates_bias(b):                    # [3H] -> [1, 3*Hp]
        out = jnp.zeros((1, 3 * Hp), jnp.float32)
        for g in range(3):
            out = out.at[0, g * Hp: g * Hp + H].set(b[g * H:(g + 1) * H])
        return out

    w_ih_t = pack_gates_T(raw["w_ih"])                                   # [I, 3*Hp]
    w_hh_t = jnp.zeros((Hp, 3 * Hp), jnp.float32).at[:H, :].set(
        pack_gates_T(raw["w_hh"]))                                       # [Hp, 3*Hp]
    w_out_t = jnp.zeros((Hp, Op), jnp.float32).at[:H, :O].set(raw["w_out"].T)
    b_out = jnp.zeros((1, Op), jnp.float32).at[0, :O].set(raw["b_out"])
    return dict(w_ih_t=w_ih_t, w_hh_t=w_hh_t,
                b_ih=pack_gates_bias(raw["b_ih"]),
                b_hh=pack_gates_bias(raw["b_hh"]),
                w_out_t=w_out_t, b_out=b_out,
                latent_ics=raw["latent_ics"],
                dims=(I, H, O, Hp, Op))


def init_hidden(params, batch_size):
    H = params["dims"][1]
    return jnp.broadcast_to(params["latent_ics"][None, :], (batch_size, H))


# -----------------------------------------------------------------------------
# Demo + correctness check
# -----------------------------------------------------------------------------
if __name__ == "__main__":
    B, I, H, O, T = 2, 4, 32, 8, 8   # batch, input, latent, output, seq len

    key = jax.random.PRNGKey(0)
    k_p, k_x, k_h = jax.random.split(key, 3)

    raw = init_params(k_p, I, H, O)
    params = pack_params(raw)

    x_seq = jax.random.normal(k_x, (T, B, I), jnp.float32)
    h0 = init_hidden(params, B) + 0.1 * jax.random.normal(k_h, (B, H), jnp.float32)

    # Single step (exactly the torch module's forward) and full sequence.
    out1, h1 = gru_rnn_forward(x_seq[0], h0, params)
    out_seq, h_T = gru_rnn_forward_seq(x_seq, h0, params)
    jax.block_until_ready((out1, h1, out_seq, h_T))

    # Pure-JAX reference (same math as torch.nn.GRUCell + Linear).
    def ref_step(x, h):
        gi = x @ raw["w_ih"].T + raw["b_ih"]
        gh = h @ raw["w_hh"].T + raw["b_hh"]
        r = jax.nn.sigmoid(gi[:, :H] + gh[:, :H])
        z = jax.nn.sigmoid(gi[:, H:2 * H] + gh[:, H:2 * H])
        n = jnp.tanh(gi[:, 2 * H:] + r * gh[:, 2 * H:])
        h_new = (1.0 - z) * n + z * h
        return h_new @ raw["w_out"].T + raw["b_out"], h_new

    o_ref1, h_ref1 = ref_step(x_seq[0], h0)
    h_ref = h0
    outs_ref = []
    for t in range(T):
        o_t, h_ref = ref_step(x_seq[t], h_ref)
        outs_ref.append(o_t)
    out_ref_seq = jnp.stack(outs_ref)

    assert jnp.allclose(h1, h_ref1, atol=1e-4), "single-step hidden mismatch"
    assert jnp.allclose(out1, o_ref1, atol=1e-4), "single-step output mismatch"
    assert jnp.allclose(h_T, h_ref, atol=1e-4), "sequence hidden mismatch"
    assert jnp.allclose(out_seq, out_ref_seq, atol=1e-4), "sequence output mismatch"

    # bf16 weight path (v6e/v7x MXU fast path); f32 accumulation keeps it close.
    out_bf, h_bf = gru_rnn_forward_seq(x_seq, h0, params, weight_dtype=jnp.bfloat16)
    jax.block_until_ready((out_bf, h_bf))
    assert bool(jnp.all(jnp.isfinite(out_bf)))
    assert jnp.allclose(out_bf, out_ref_seq, atol=0.25), "bf16 path diverged"

    print("KERNEL_OK")
</pallas_src>

<mosaic_0001>
module attributes {stable_mosaic.version = 11 : i64} {
  func.func @_gru_chunk_kernel(%arg0: i32, %arg1: i32, %arg2: memref<1x8x384xf32, #tpu.memory_space<vmem>>, %arg3: memref<8x128xf32, #tpu.memory_space<vmem>>, %arg4: memref<128x384xf32, #tpu.memory_space<vmem>>, %arg5: memref<1x384xf32, #tpu.memory_space<vmem>>, %arg6: memref<1x8x128xf32, #tpu.memory_space<vmem>>, %arg7: memref<8x128xf32, #tpu.memory_space<vmem>>) attributes {dimension_semantics = [#tpu.dimension_semantics<parallel>, #tpu.dimension_semantics<arbitrary>], iteration_bounds = array<i64: 1, 1>, scalar_prefetch = 0 : i64, scratch_operands = 1 : i64, tpu.core_type = #tpu.core_type<tc>, window_params = [{transform_indices = @transform_0, window_bounds = array<i64: 1, 8, 384>}, {transform_indices = @transform_1, window_bounds = array<i64: 8, 128>}, {pipeline_mode = #tpu.pipeline_mode<synchronous>, transform_indices = @transform_2, window_bounds = array<i64: 128, 384>}, {pipeline_mode = #tpu.pipeline_mode<synchronous>, transform_indices = @transform_3, window_bounds = array<i64: 1, 384>}, {transform_indices = @transform_4, window_bounds = array<i64: 1, 8, 128>}]} {
    %c0_i32 = arith.constant 0 : i32
    %0 = arith.cmpi eq, %arg1, %c0_i32 : i32
    %1 = arith.extui %0 : i1 to i32
    %c0_i32_0 = arith.constant 0 : i32
    %2 = arith.cmpi ne, %1, %c0_i32_0 : i32
    scf.if %2 {
      %c0_17 = arith.constant 0 : index
      %c0_18 = arith.constant 0 : index
      %41 = vector.load %arg3[%c0_17, %c0_18] : memref<8x128xf32, #tpu.memory_space<vmem>>, vector<8x128xf32>
      %c0_19 = arith.constant 0 : index
      %c0_20 = arith.constant 0 : index
      %42 = vector.load %arg7[%c0_19, %c0_20] : memref<8x128xf32, #tpu.memory_space<vmem>>, vector<8x128xf32>
      tpu.vector_store %arg7[%c0_19, %c0_20], %41 {strides = array<i32>} : memref<8x128xf32, #tpu.memory_space<vmem>>, vector<8x128xf32>,
    } else {
    }
    %c0 = arith.constant 0 : index
    %c0_1 = arith.constant 0 : index
    %3 = vector.load %arg4[%c0, %c0_1] : memref<128x384xf32, #tpu.memory_space<vmem>>, vector<128x384xf32>
    %c0_2 = arith.constant 0 : index
    %c0_3 = arith.constant 0 : index
    %4 = vector.load %arg5[%c0_2, %c0_3] : memref<1x384xf32, #tpu.memory_space<vmem>>, vector<1x384xf32>
    %c0_4 = arith.constant 0 : index
    %c0_5 = arith.constant 0 : index
    %5 = vector.load %arg7[%c0_4, %c0_5] : memref<8x128xf32, #tpu.memory_space<vmem>>, vector<8x128xf32>
    %c0_6 = arith.constant 0 : index
    %c0_7 = arith.constant 0 : index
    %c0_8 = arith.constant 0 : index
    %6 = vector.load %arg2[%c0_6, %c0_7, %c0_8] : memref<1x8x384xf32, #tpu.memory_space<vmem>>, vector<1x8x384xf32>
    %7 = vector.shape_cast %6 : vector<1x8x384xf32> to vector<8x384xf32>
    %cst = arith.constant dense<0.000000e+00> : vector<8x384xf32>
    %8 = tpu.matmul %5, %3, %cst {dimension_numbers = #tpu.dot_dimension_numbers<[1], [0], [0], [1], [0, 0, 1, 1], [], []>} : vector<8x128xf32>, vector<128x384xf32>, vector<8x384xf32> -> vector<8x384xf32>
    %9 = vector.broadcast %4 : vector<1x384xf32> to vector<8x384xf32>
    %10 = arith.addf %8, %9 : vector<8x384xf32>
    %11 = vector.extract_strided_slice %7 {offsets = [0, 0], sizes = [8, 128], strides = [1, 1]} : vector<8x384xf32> to vector<8x128xf32>
    %12 = vector.extract_strided_slice %10 {offsets = [0, 0], sizes = [8, 128], strides = [1, 1]} : vector<8x384xf32> to vector<8x128xf32>
    %13 = arith.addf %11, %12 : vector<8x128xf32>
    %14 = arith.negf %13 : vector<8x128xf32>
    %15 = math.exp %14 : vector<8x128xf32>
    %cst_9 = arith.constant 1.000000e+00 : f32
    %16 = vector.broadcast %cst_9 : f32 to vector<8x128xf32>
    %17 = arith.addf %16, %15 : vector<8x128xf32>
    %18 = arith.divf %16, %17 : vector<8x128xf32>
    %19 = vector.extract_strided_slice %7 {offsets = [0, 128], sizes = [8, 128], strides = [1, 1]} : vector<8x384xf32> to vector<8x128xf32>
    %20 = vector.extract_strided_slice %10 {offsets = [0, 128], sizes = [8, 128], strides = [1, 1]} : vector<8x384xf32> to vector<8x128xf32>
    %21 = arith.addf %19, %20 : vector<8x128xf32>
    %22 = arith.negf %21 : vector<8x128xf32>
    %23 = math.exp %22 : vector<8x128xf32>
    %cst_10 = arith.constant 1.000000e+00 : f32
    %24 = vector.broadcast %cst_10 : f32 to vector<8x128xf32>
    %25 = arith.addf %24, %23 : vector<8x128xf32>
    %26 = arith.divf %24, %25 : vector<8x128xf32>
    %27 = vector.extract_strided_slice %7 {offsets = [0, 256], sizes = [8, 128], strides = [1, 1]} : vector<8x384xf32> to vector<8x128xf32>
    %28 = vector.extract_strided_slice %10 {offsets = [0, 256], sizes = [8, 128], strides = [1, 1]} : vector<8x384xf32> to vector<8x128xf32>
    %29 = arith.mulf %18, %28 : vector<8x128xf32>
    %30 = arith.addf %27, %29 : vector<8x128xf32>
    %31 = math.tanh %30 : vector<8x128xf32>
    %cst_11 = arith.constant 1.000000e+00 : f32
    %32 = vector.broadcast %cst_11 : f32 to vector<8x128xf32>
    %33 = arith.subf %32, %26 : vector<8x128xf32>
    %34 = arith.mulf %33, %31 : vector<8x128xf32>
    %35 = arith.mulf %26, %5 : vector<8x128xf32>
    %36 = arith.addf %34, %35 : vector<8x128xf32>
    %c0_12 = arith.constant 0 : index
    %c0_13 = arith.constant 0 : index
    %c0_14 = arith.constant 0 : index
    %37 = vector.load %arg6[%c0_12, %c0_13, %c0_14] : memref<1x8x128xf32, #tpu.memory_space<vmem>>, vector<1x8x128xf32>
    %38 = vector.shape_cast %37 : vector<1x8x128xf32> to vector<8x128xf32>
    %39 = vector.shape_cast %36 : vector<8x128xf32> to vector<1x8x128xf32>
    tpu.vector_store %arg6[%c0_12, %c0_13, %c0_14], %39 {strides = array<i32>} : memref<1x8x128xf32, #tpu.memory_space<vmem>>, vector<1x8x128xf32>,
    %c0_15 = arith.constant 0 : index
    %c0_16 = arith.constant 0 : index
    %40 = vector.load %arg7[%c0_15, %c0_16] : memref<8x128xf32, #tpu.memory_space<vmem>>, vector<8x128xf32>
    tpu.vector_store %arg7[%c0_15, %c0_16], %36 {strides = array<i32>} : memref<8x128xf32, #tpu.memory_space<vmem>>, vector<8x128xf32>,
    return
  }
  func.func @transform_0(%arg0: i32, %arg1: i32) -> (i32, i32, i32) {
    %c0_i32 = arith.constant 0 : i32
    %c0_i32_0 = arith.constant 0 : i32
    return %arg1, %arg0, %c0_i32 : i32, i32, i32
  }
  func.func @transform_1(%arg0: i32, %arg1: i32) -> (i32, i32) {
    %c0_i32 = arith.constant 0 : i32
    %c0_i32_0 = arith.constant 0 : i32
    return %arg0, %c0_i32 : i32, i32
  }
  func.func @transform_2(%arg0: i32, %arg1: i32) -> (i32, i32) {
    %c0_i32 = arith.constant 0 : i32
    %c0_i32_0 = arith.constant 0 : i32
    %c0_i32_1 = arith.constant 0 : i32
    return %c0_i32, %c0_i32_0 : i32, i32
  }
  func.func @transform_3(%arg0: i32, %arg1: i32) -> (i32, i32) {
    %c0_i32 = arith.constant 0 : i32
    %c0_i32_0 = arith.constant 0 : i32
    %c0_i32_1 = arith.constant 0 : i32
    return %c0_i32, %c0_i32_0 : i32, i32
  }
  func.func @transform_4(%arg0: i32, %arg1: i32) -> (i32, i32, i32) {
    %c0_i32 = arith.constant 0 : i32
    %c0_i32_0 = arith.constant 0 : i32
    return %arg1, %arg0, %c0_i32 : i32, i32, i32
  }
}

</mosaic_0001>

<bundles_post_ra>
// kernel: tpu_custom_call.1
= control target key start
LH: loop header
LB: loop body
LE: loop exit
PB: predicated region body
PF: predicated region fallthrough
CT: control target
= control target key end

     0   :  { %9 = vsyncpa [#allocation4], 0  ;;  %s626_s0 = inlined_call_operand.hbm [shape: f32[1,8,384], index: 0, kind: input, shape index: {}]   ;;  %s627_s1 = inlined_call_operand.hbm [shape: f32[8,128], index: 1, kind: input, shape index: {}]   ;;  %s628_s2 = inlined_call_operand.hbm [shape: f32[128,384], index: 2, kind: input, shape index: {}]   ;;  %s629_s3 = inlined_call_operand.vmem [shape: f32[1,384], index: 3, kind: input, shape index: {}]   ;;  %s630_s4 = inlined_call_operand.hbm [shape: f32[1,8,128], index: 4, kind: output, shape index: {}]  }
   0x1   :  { %10 = vsyncpa [#allocation7], 0 }
   0x2   :  { %11 = vsyncpa [#allocation5], 0  ;;  %s533_s15 = smov [#allocation6]   ;;  %s534_s17 = smov [#allocation3]  }
   0x3   :  { %s28_s16 = sshll.u32 %s533_s15, 4  ;;  %s18_s18 = sshll.u32 %s534_s17, 4  ;;  %s29_s16 = int_to_ptr.vmem [resolvable:$true] %s28_s16  ;;  %s19_s18 = int_to_ptr.vmem [resolvable:$true] %s18_s18 }
   0x4   :  { %s439_s21 = scalar_lea.hbm %s627_s1, 128 }
   0x5   :  { %p440_p0 = scmp.ne.s32.totalorder %s627_s1, %s439_s21  ;;  %p443_p1 = scmp.lt.u32.totalorder %s439_s21, %s627_s1 }
   0x7   :  { %p445_p2 = pnand %p443_p1, %p440_p0 }
   0x9   :  { %448 = shalt.err (!%p445_p2)
}
   0xa   :  { %s449_s26 = scalar_lea.vmem %s29_s16, 128  ;;  %p454_p4 = scmp.lt.s32.totalorder %s29_s16, %s29_s16 }
   0xb   :  { %p450_p3 = scmp.ne.s32.totalorder %s29_s16, %s449_s26  ;;  %p455_p5 = scmp.lt.s32.totalorder %s449_s26, %s449_s26 }
   0xd   :  { %p456_p6 = por %p455_p5, %p454_p4 }
   0xf   :  { %p457_p7 = pnand %p456_p6, %p450_p3 }
  0x11   :  { %460 = shalt.err (!%p457_p7)
}
  0x12   :  { %31 = dma.hbm_to_vmem [thread:$0]  %s627_s1, 128, %s29_s16, [#allocation7]  }
  0x13   :  { %s461_s5 = scalar_lea.hbm %s626_s0, 384 }
  0x14   :  { %p462_p8 = scmp.ne.s32.totalorder %s626_s0, %s461_s5  ;;  %p465_p9 = scmp.lt.u32.totalorder %s461_s5, %s626_s0 }
  0x16   :  { %p467_p10 = pnand %p465_p9, %p462_p8 }
  0x18   :  { %470 = shalt.err (!%p467_p10)
}
  0x19   :  { %s471_s10 = scalar_lea.vmem %s19_s18, 384  ;;  %p476_p12 = scmp.lt.s32.totalorder %s19_s18, %s19_s18 }
  0x1a   :  { %p472_p11 = scmp.ne.s32.totalorder %s19_s18, %s471_s10  ;;  %p477_p13 = scmp.lt.s32.totalorder %s471_s10, %s471_s10 }
  0x1c   :  { %p478_p0 = por %p477_p13, %p476_p12 }
  0x1e   :  { %p479_p1 = pnand %p478_p0, %p472_p11 }
  0x20   :  { %482 = shalt.err (!%p479_p1)
}
  0x21   :  { %21 = dma.hbm_to_vmem [thread:$0]  %s626_s0, 384, %s19_s18, [#allocation4]  }
  0x22   :  { %s535_s12 = smov [#allocation8]   ;;  %s483_s16 = scalar_lea.hbm %s628_s2, 6144 }
  0x23   :  { %s37_s13 = sshll.u32 %s535_s12, 4  ;;  %p484_p2 = scmp.ne.s32.totalorder %s628_s2, %s483_s16  ;;  %s38_s13 = int_to_ptr.vmem [resolvable:$true] %s37_s13 }
  0x24   :  { %p487_p3 = scmp.lt.u32.totalorder %s483_s16, %s628_s2 }
  0x26   :  { %p489_p4 = pnand %p487_p3, %p484_p2 }
  0x28   :  { %492 = shalt.err (!%p489_p4)
}
  0x29   :  { %s493_s22 = scalar_lea.vmem %s38_s13, 6144  ;;  %p498_p6 = scmp.lt.s32.totalorder %s38_s13, %s38_s13 }
  0x2a   :  { %p494_p5 = scmp.ne.s32.totalorder %s38_s13, %s493_s22  ;;  %p499_p7 = scmp.lt.s32.totalorder %s493_s22, %s493_s22 }
  0x2c   :  { %p500_p8 = por %p499_p7, %p498_p6 }
  0x2e   :  { %p501_p9 = pnand %p500_p8, %p494_p5 }
  0x30   :  { %504 = shalt.err (!%p501_p9)
}
  0x31   :  { %s536_s0 = smov 384   ;;  %s537_s18 = smov 24  }
  0x32   :  { %43 = dma.hbm_to_vmem [thread:$0]  %s628_s2, 6144, %s38_s13, [#allocation7], %s536_s0, %s536_s0, %s537_s18  }
  0x33   :  { %527 = dma.done.wait [#allocation4], 384  }
  0x34   :  { %528 = vsyncadd [#allocation4], 4294966912 }
  0x35   :  { %529 = dma.done.wait [#allocation7], 6272  }
  0x36   :  { %530 = vsyncadd [#allocation7], 4294961024  ;;  %v538_v0 = vmov 0.0|0.0   ;;  %v539_v1 = vmov 0.0   ;;  %vm540_vm0 = vmmov 0   ;;  %v62_v2 = vld [vmem:[#allocation8 + $0x8] sm:$0xff] }
  0x37   :  { %396 = vmatprep.subr.bf16.mxu1 %v538_v0  ;;  %194 = vmatprep.mubr.f32.mxu0 %v539_v1  ;;  %v65_v3 = vld [vmem:[#allocation8 + $0x20] sm:$0xff]  ;;  %v64_v6 = vld [vmem:[#allocation8 + $0x18] sm:$0xff]  ;;  %v71_v8 = vld [vmem:[#allocation8 + $0x50] sm:$0xff] }
  0x38   :  { %361 = vmatprep.mubr.msk.f32.mxu1 %vm540_vm0, %v539_v1  ;;  %v61_v4 = vld [vmem:[#allocation8] sm:$0xff]  ;;  %v364_v5 = vpack.c.bf16 %v65_v3, %v62_v2  ;;  %v68_v7 = vld [vmem:[#allocation8 + $0x38] sm:$0xff]  ;;  %v67_v11 = vld [vmem:[#allocation8 + $0x30] sm:$0xff] }
  0x39   :  { %v366_v9 = vpack.c.bf16 %v64_v6, %v61_v4  ;;  %v368_v10 = vpack.c.bf16 %v71_v8, %v68_v7  ;;  %v70_v12 = vld [vmem:[#allocation8 + $0x48] sm:$0xff]  ;;  %v77_v14 = vld [vmem:[#allocation8 + $0x80] sm:$0xff]  ;;  %v76_v18 = vld [vmem:[#allocation8 + $0x78] sm:$0xff] }
  0x3a   :  { %v74_v13 = vld [vmem:[#allocation8 + $0x68] sm:$0xff]  ;;  %365 = vmatprep.subr.bf16.mxu0 %v364_v5  ;;  %v370_v15 = vpack.c.bf16 %v70_v12, %v67_v11  ;;  %v73_v17 = vld [vmem:[#allocation8 + $0x60] sm:$0xff]  ;;  %v80_v19 = vld [vmem:[#allocation8 + $0x98] sm:$0xff]  ;;  %v115_v12 = vlaneseq }
  0x3b   :  { %367 = vmatpush1.bf16.msra.mxu0 %v366_v9  ;;  %v372_v16 = vpack.c.bf16 %v77_v14, %v74_v13  ;;  %v83_v20 = vld [vmem:[#allocation8 + $0xb0] sm:$0xff]  ;;  %v374_v21 = vpack.c.bf16 %v76_v18, %v73_v17  ;;  %v82_v24 = vld [vmem:[#allocation8 + $0xa8] sm:$0xff]  ;;  %v89_v26 = vld [vmem:[#allocation8 + $0xe0] sm:$0xff] }
  0x3c   :  { %369 = vmatprep.subr.bf16.mxu0 %v368_v10  ;;  %v376_v22 = vpack.c.bf16 %v83_v20, %v80_v19  ;;  %v79_v23 = vld [vmem:[#allocation8 + $0x90] sm:$0xff]  ;;  %v86_v25 = vld [vmem:[#allocation8 + $0xc8] sm:$0xff]  ;;  %v69_v30 = vld [vmem:[#allocation8 + $0x40] sm:$0xff]  ;;  %v116_v13 = vshrl.u32 %v115_v12, 7 }
  0x3d   :  { %v63_v27 = vld [vmem:[#allocation8 + $0x10] sm:$0xff]  ;;  %v66_v28 = vld [vmem:[#allocation8 + $0x28] sm:$0xff]  ;;  %v378_v31 = vpack.c.bf16 %v82_v24, %v79_v23  ;;  %v72_v32 = vld [vmem:[#allocation8 + $0x58] sm:$0xff]  ;;  %v380_v33 = vpack.c.bf16 %v89_v26, %v86_v25 }
  0x3e   :  { %v397_v29 = vpack.c.bf16 %v66_v28, %v63_v27  ;;  %v85_v34 = vld [vmem:[#allocation8 + $0xc0] sm:$0xff]  ;;  %v88_v35 = vld [vmem:[#allocation8 + $0xd8] sm:$0xff]  ;;  %v400_v37 = vpack.c.bf16 %v72_v32, %v69_v30  ;;  %v95_v38 = vld [vmem:[#allocation8 + $0x110] sm:$0xff]  ;;  %v117_v14 = vsub.s32 0, %v116_v13  ;;  %v125_v32 = vsub.s32 2, %v116_v13 }
  0x3f   :  { %371 = vmatpush1.bf16.msra.mxu0 %v370_v15  ;;  %v92_v36 = vld [vmem:[#allocation8 + $0xf8] sm:$0xff]  ;;  %v75_v39 = vld [vmem:[#allocation8 + $0x70] sm:$0xff]  ;;  %v78_v40 = vld [vmem:[#allocation8 + $0x88] sm:$0xff]  ;;  %v382_v41 = vpack.c.bf16 %v88_v35, %v85_v34 }
  0x40   :  { %373 = vmatprep.subr.bf16.mxu0 %v372_v16  ;;  %398 = vmatpush3.bf16.msra.mxu1 %v397_v29  ;;  %v384_v42 = vpack.c.bf16 %v95_v38, %v92_v36  ;;  %v91_v43 = vld [vmem:[#allocation8 + $0xf0] sm:$0xff]  ;;  %v94_v44 = vld [vmem:[#allocation8 + $0x108] sm:$0xff]  ;;  %v403_v46 = vpack.c.bf16 %v78_v40, %v75_v39  ;;  %v101_v47 = vld [vmem:[#allocation8 + $0x140] sm:$0xff]  ;;  %v121_v16 = vsub.s32 1, %v116_v13 }
  0x41   :  { %399 = vmatprep.subr.bf16.mxu1 %v538_v0  ;;  %v98_v45 = vld [vmem:[#allocation8 + $0x128] sm:$0xff]  ;;  %v81_v48 = vld [vmem:[#allocation8 + $0xa0] sm:$0xff]  ;;  %v84_v49 = vld [vmem:[#allocation8 + $0xb8] sm:$0xff]  ;;  %v386_v50 = vpack.c.bf16 %v94_v44, %v91_v43 }
  0x42   :  { %v388_v51 = vpack.c.bf16 %v101_v47, %v98_v45  ;;  %v97_v52 = vld [vmem:[#allocation8 + $0x120] sm:$0xff]  ;;  %v100_v53 = vld [vmem:[#allocation8 + $0x138] sm:$0xff]  ;;  %v406_v55 = vpack.c.bf16 %v84_v49, %v81_v48  ;;  %v107_v56 = vld [vmem:[#allocation8 + $0x170] sm:$0xff] }
  0x43   :  { %375 = vmatpush1.bf16.msra.mxu0 %v374_v21  ;;  %v104_v54 = vld [vmem:[#allocation8 + $0x158] sm:$0xff]  ;;  %v87_v57 = vld [vmem:[#allocation8 + $0xd0] sm:$0xff]  ;;  %v90_v58 = vld [vmem:[#allocation8 + $0xe8] sm:$0xff]  ;;  %v390_v59 = vpack.c.bf16 %v100_v53, %v97_v52 }
  0x44   :  { %377 = vmatprep.subr.bf16.mxu0 %v376_v22  ;;  %401 = vmatpush3.bf16.msra.mxu1 %v400_v37  ;;  %v392_v60 = vpack.c.bf16 %v107_v56, %v104_v54  ;;  %v103_v61 = vld [vmem:[#allocation8 + $0x150] sm:$0xff]  ;;  %v106_v62 = vld [vmem:[#allocation8 + $0x168] sm:$0xff]  ;;  %v409_v63 = vpack.c.bf16 %v90_v58, %v87_v57  ;;  %v93_v1 = vld [vmem:[#allocation8 + $0x100] sm:$0xff] }
  0x45   :  { %402 = vmatprep.subr.bf16.mxu1 %v538_v0  ;;  %v96_v2 = vld [vmem:[#allocation8 + $0x118] sm:$0xff]  ;;  %v394_v3 = vpack.c.bf16 %v106_v62, %v103_v61  ;;  %v99_v5 = vld [vmem:[#allocation8 + $0x130] sm:$0xff]  ;;  %v102_v6 = vld [vmem:[#allocation8 + $0x148] sm:$0xff] }
  0x46   :  { %v412_v4 = vpack.c.bf16 %v96_v2, %v93_v1  ;;  %v59_v7 = vld [vmem:[#allocation6] sm:$0xff]  ;;  %v415_v8 = vpack.c.bf16 %v102_v6, %v99_v5  ;;  %v105_v9 = vld [vmem:[#allocation8 + $0x160] sm:$0xff]  ;;  %v112_v25 = vld [vmem:[#allocation3 + $0x8] sm:$0xff] }
  0x47   :  { %379 = vmatpush1.bf16.msra.mxu0 %v378_v31  ;;  %v108_v10 = vld [vmem:[#allocation8 + $0x178] sm:$0xff]  ;;  %v109_v15 = vld [vmem:[%s629_s3] sm:$0x7]  ;;  %v113_v38 = vld [vmem:[#allocation3 + $0x10] sm:$0xff]  ;;  %s541_s3 = smov [#allocation9]  }
  0x48   :  { %381 = vmatprep.subr.bf16.mxu0 %v380_v33  ;;  %404 = vmatpush3.bf16.msra.mxu1 %v403_v46  ;;  %v418_v11 = vpack.c.bf16 %v108_v10, %v105_v9  ;;  %v118_v17 = vrot.slane %v109_v15, %v117_v14  ;;  %v122_v18 = vrot.slane %v109_v15, %v121_v16  ;;  %v111_v19 = vld [vmem:[#allocation3] sm:$0xff]  ;;  %s300_s26 = sshll.u32 %s541_s3, 4  ;;  %s301_s26 = int_to_ptr.vmem [resolvable:$true] %s300_s26 }
  0x49   :  { %405 = vmatprep.subr.bf16.mxu1 %v538_v0  ;;  %v126_v33 = vrot.slane %v109_v15, %v125_v32  ;;  %s505_s27 = scalar_lea.vmem %s301_s26, 128  ;;  %p510_p11 = scmp.lt.s32.totalorder %s301_s26, %s301_s26 }
  0x4a   :  { %p506_p10 = scmp.ne.s32.totalorder %s301_s26, %s505_s27  ;;  %p511_p12 = scmp.lt.s32.totalorder %s505_s27, %s505_s27 }
  0x4b   :  { %383 = vmatpush1.bf16.msra.mxu0 %v382_v41 }
  0x4c   :  { %385 = vmatprep.subr.bf16.mxu0 %v384_v42  ;;  %407 = vmatpush3.bf16.msra.mxu1 %v406_v55  ;;  %p512_p13 = por %p511_p12, %p510_p11 }
  0x4d   :  { %408 = vmatprep.subr.bf16.mxu1 %v538_v0 }
  0x4e   :  { %p513_p0 = pnand %p512_p13, %p506_p10 }
  0x4f   :  { %387 = vmatpush1.bf16.msra.mxu0 %v386_v50 }
  0x50   :  { %389 = vmatprep.subr.bf16.mxu0 %v388_v51  ;;  %410 = vmatpush3.bf16.msra.mxu1 %v409_v63 }
  0x51   :  { %411 = vmatprep.subr.bf16.mxu1 %v538_v0 }
  0x53   :  { %391 = vmatpush1.bf16.msra.mxu0 %v390_v59 }
  0x54   :  { %393 = vmatprep.subr.bf16.mxu0 %v392_v60  ;;  %413 = vmatpush3.bf16.msra.mxu1 %v412_v4 }
  0x55   :  { %414 = vmatprep.subr.bf16.mxu1 %v538_v0 }
  0x57   :  { %395 = vmatpush1.bf16.msra.mxu0 %v394_v3 }
  0x58   :  { %416 = vmatpush3.bf16.msra.mxu1 %v415_v8 }
  0x59   :  { %417 = vmatprep.subr.bf16.mxu1 %v538_v0 }
  0x5a   :  { %195 = vmatmul.mubr.f32.vlgmr.msra.gmra.mrb[0].mxu0 %v59_v7 }
  0x5c   :  { %419 = vmatpush3.bf16.msra.mxu1 %v418_v11 }
  0x5f   :  { %362 = vmatmul.mubr.f32.vlgmr.msra.gmra.mrb[0].mxu1 %v59_v7 }
 0x12d   :  { %v196_v20 = vpop.f32.mrb[0].mxu0 }
 0x12e   :  { %v197_v21 = vadd.f32 %v196_v20, %v118_v17  ;;  %v198_v22 = vpop.f32.mrb[1].mxu0 }
 0x12f   :  { %v199_v23 = vadd.f32 %v198_v22, %v122_v18 }
 0x130   :  { %v271_v24 = vadd.f32 %v197_v21, %v111_v19 }
 0x131   :  { %v278_v26 = vadd.f32 %v199_v23, %v112_v25 }
 0x132   :  { %v310_v0 = vmul.f32 -1.442695, %v271_v24  ;;  %v267_v27 = vpop.f32.mrb[0].mxu1 }
 0x133   :  { %v311_v28 = vmul.f32 -1.442695, %v278_v26  ;;  %v363_v29 = vpop.f32.mrb[1].mxu1  ;;  %v268_v36 = vadd.f32 %v267_v27, %v126_v33 }
 0x134   :  { %429 = vpow2.f32 %v310_v0 }
 0x135   :  { %431 = vpow2.f32 %v311_v28 }
 0x13e   :  { %v430_v30 = vpop.eup %429 }
 0x13f   :  { %v275_v31 = vadd.f32 1.0, %v430_v30  ;;  %v432_v34 = vpop.eup %431 }
 0x140   :  { %v282_v35 = vadd.f32 1.0, %v432_v34 }
 0x141   :  { %433 = vrcp.f32 %v275_v31 }
 0x142   :  { %435 = vrcp.f32 %v282_v35 }
 0x14b   :  { %v434_v37 = vpop.eup %433 }
 0x14c   :  { %v285_v39 = vmul.f32 %v434_v37, %v268_v36  ;;  %v436_v41 = vpop.eup %435 }
 0x14d   :  { %v288_v42 = vsub.f32 1.0, %v436_v41  ;;  %v290_v45 = vmul.f32 %v436_v41, %v59_v7 }
 0x14e   :  { %v286_v40 = vadd.f32 %v285_v39, %v113_v38 }
 0x150   :  { %437 = vtanh.f32 %v286_v40 }
 0x15a   :  { %v438_v43 = vpop.eup %437 }
 0x15b   :  { %v289_v44 = vmul.f32 %v438_v43, %v288_v42 }
 0x15d   :  { %v291_v46 = vadd.f32 %v290_v45, %v289_v44 }
 0x15f   :  { %292 = vst [vmem:[#allocation9] sm:$0xff] %v291_v46 }
 0x160   :  { %516 = shalt.err (!%p513_p0)
}
 0x161   :  { %s517_s30 = scalar_lea.hbm %s630_s4, 128 }
 0x162   :  { %p518_p1 = scmp.ne.s32.totalorder %s630_s4, %s517_s30  ;;  %p521_p2 = scmp.lt.u32.totalorder %s517_s30, %s630_s4 }
 0x164   :  { %p523_p3 = pnand %p521_p2, %p518_p1 }
 0x166   :  { %526 = shalt.err (!%p523_p3)
}
 0x167   :  { %303 = dma.vmem_to_hbm [thread:$0]  %s301_s26, 128, %s630_s4, [#allocation5]  }
 0x168   :  { %531 = dma.done.wait [#allocation5], 128  }
 0x169   :  { %532 = vsyncadd [#allocation5], 4294967168 }
 0x16a   :  { %307 = vsyncpa [#allocation4], 1 }
 0x16b   :  { %308 = vsyncpa [#allocation7], 1 }
 0x16c   :  { %309 = vsyncpa [#allocation5], 1 }

</bundles_post_ra>
